<compile_context>
chip_gen: v6e
topology: v6e:2x2x1
jax: 0.10.0
libtpu: 0.0.40
codegen_flags: <defaults>
</compile_context>

<pallas_src>
import functools

import jax
import jax.numpy as jnp
from jax import lax
from jax.experimental import pallas as pl
from jax.experimental.pallas import tpu as pltpu


_MAX_ROW_TILE = 1024


def _round_up(x, m):
    return ((x + m - 1) // m) * m


def _budgets():
    """(vmem_limit_bytes, tile_budget_bytes, fuse_bytes) gated per generation."""
    cap = None
    try:
        cap = getattr(pltpu.get_tpu_info(), "vmem_capacity_bytes", None)
    except Exception:
        cap = None
    if cap is None:
        cap = 64 * 1024 * 1024          # conservative (v7x-sized) fallback
    if cap >= 128 * 1024 * 1024:        # v5e / v6e: 128 MiB VMEM
        return 96 * 1024 * 1024, 40 * 1024 * 1024, 16 * 1024 * 1024
    # v7x (64 MiB per TensorCore) or unknown.
    return 48 * 1024 * 1024, 16 * 1024 * 1024, 8 * 1024 * 1024


def _combine_lane_groups(v, k):
    """Sum the k replica lane-groups of a (1, k*C) vector.

    After log2(k) circular lane rotations (XLU) + adds, every lane holds the
    total over its replica group (lanes congruent mod C) -- no re-tiling needed.
    Only used when k > 1, in which case cw == 128 and k is a power of two.
    """
    cw = v.shape[-1]
    group = cw // k
    step = cw // 2
    while step >= group:
        v = v + pltpu.roll(v, step, axis=1)
        step //= 2
    return v


# --------------------------------------------------------------------------- #
# Fused path: stats + normalize in one kernel, x read from HBM exactly once.
# Grid over channel blocks ("parallel"): per-block stats are independent.
# --------------------------------------------------------------------------- #
def _fused_kernel(x_ref, gamma_ref, beta_ref, shift_ref, o_ref, *, n_true, k, eps):
    xb = x_ref[...].astype(jnp.float32) - shift_ref[...]      # shifted for stability
    s = jnp.sum(xb, axis=0, keepdims=True)
    q = jnp.sum(xb * xb, axis=0, keepdims=True)
    if k > 1:
        s = _combine_lane_groups(s, k)
        q = _combine_lane_groups(q, k)
    inv_n = 1.0 / float(n_true)
    mean_sh = s * inv_n
    var = jnp.maximum(q * inv_n - mean_sh * mean_sh, 0.0)     # biased var, clamped
    rstd = lax.rsqrt(var + eps)                               # EUP slot
    scale = rstd * gamma_ref[...]
    bias_sh = beta_ref[...] - mean_sh * scale
    o_ref[...] = (xb * scale + bias_sh).astype(o_ref.dtype)


def _fused_forward(xw, gamma_w, beta_w, shift_w, eps, n_true, k, vmem_limit):
    n, cw = xw.shape
    # Channel tile: at least 2 blocks when possible (pipelining + megacore).
    c_tile = cw
    if k == 1 and cw % 128 == 0 and cw // 128 >= 2:
        for cand in (512, 256, 128):
            if cw % cand == 0 and cw // cand >= 2:
                c_tile = cand
                break
    n_c = cw // c_tile

    kernel = functools.partial(_fused_kernel, n_true=n_true, k=k, eps=eps)
    return pl.pallas_call(
        kernel,
        out_shape=jax.ShapeDtypeStruct((n, cw), xw.dtype),
        grid_spec=pltpu.PrefetchScalarGridSpec(
            num_scalar_prefetch=0,
            grid=(n_c,),
            in_specs=[
                pl.BlockSpec((n, c_tile), lambda j: (0, j)),
                pl.BlockSpec((1, c_tile), lambda j: (0, j)),
                pl.BlockSpec((1, c_tile), lambda j: (0, j)),
                pl.BlockSpec((1, c_tile), lambda j: (0, j)),
            ],
            out_specs=pl.BlockSpec((n, c_tile), lambda j: (0, j)),
        ),
        compiler_params=pltpu.CompilerParams(
            dimension_semantics=("parallel",),
            vmem_limit_bytes=vmem_limit,
        ),
        cost_estimate=pl.CostEstimate(
            flops=int(8 * n * cw),
            transcendentals=int(cw),
            bytes_accessed=int(2 * n * cw * xw.dtype.itemsize),
        ),
    )(xw, gamma_w, beta_w, shift_w)


# --------------------------------------------------------------------------- #
# Two-pass path (large inputs).
# --------------------------------------------------------------------------- #
def _stats_kernel(x_ref, shift_ref, sum_ref, sq_ref, acc_sum, acc_sq, *,
                  rows_valid, row_tile, needs_mask):
    """Accumulate per-channel shifted sum / sum-of-squares over row tiles.

    Grid = (channel_blocks [parallel], row_blocks [arbitrary]). Each tile is
    reduced to (8, c_tile) with sublane-aligned VPU adds and accumulated into
    (8, c_tile) scratch; the single cross-sublane XLU reduce runs on the last
    row step. The ragged-row mask is applied to the edge block only.
    """
    i = pl.program_id(1)
    last = pl.num_programs(1) - 1

    @pl.when(i == 0)
    def _():
        acc_sum[...] = jnp.zeros_like(acc_sum)
        acc_sq[...] = jnp.zeros_like(acc_sq)

    shift = shift_ref[...]

    def _accumulate(xb):
        g, c = xb.shape
        xs = xb.reshape(g // 8, 8, c)          # layout-preserving sublane split
        acc_sum[...] += jnp.sum(xs, axis=0)    # pure VPU adds (no XLU)
        acc_sq[...] += jnp.sum(xs * xs, axis=0)

    if needs_mask:
        @pl.when(i != last)
        def _():
            _accumulate(x_ref[...].astype(jnp.float32) - shift)

        @pl.when(i == last)
        def _():
            xb = x_ref[...].astype(jnp.float32) - shift
            row_ids = i * row_tile + lax.broadcasted_iota(jnp.int32, xb.shape, 0)
            _accumulate(jnp.where(row_ids < rows_valid, xb, 0.0))
    else:
        _accumulate(x_ref[...].astype(jnp.float32) - shift)

    @pl.when(i == last)
    def _():
        sum_ref[...] = jnp.sum(acc_sum[...], axis=0, keepdims=True)
        sq_ref[...] = jnp.sum(acc_sq[...], axis=0, keepdims=True)


def _apply_kernel(x_ref, sum_ref, sq_ref, gamma_ref, beta_ref, shift_ref, o_ref,
                  *, n_true, k, eps):
    """Fold glue math + affine into a single FMA: y = x * scale + bias.

    scale/bias are recomputed per grid step from the (1, cw) stats vectors
    (a handful of VPU ops + one EUP rsqrt -- negligible) so the row axis can
    stay "parallel" (megacore-safe, no cross-step scratch dependence).
    """
    s = sum_ref[...]
    q = sq_ref[...]
    if k > 1:
        s = _combine_lane_groups(s, k)
        q = _combine_lane_groups(q, k)
    inv_n = 1.0 / float(n_true)
    mean_sh = s * inv_n
    var = jnp.maximum(q * inv_n - mean_sh * mean_sh, 0.0)
    rstd = lax.rsqrt(var + eps)
    scale = rstd * gamma_ref[...]
    bias = beta_ref[...] - (shift_ref[...] + mean_sh) * scale
    o_ref[...] = (x_ref[...].astype(jnp.float32) * scale + bias).astype(o_ref.dtype)


def _two_pass_forward(xw, gamma_w, beta_w, shift_w, eps, n_true, k,
                      vmem_limit, tile_budget):
    r, cw = xw.shape
    itemsize = xw.dtype.itemsize

    # Channel tile for pass 1: largest of {512, 256, 128} dividing cw, else cw.
    c_tile = cw
    for cand in (512, 256, 128):
        if cw % cand == 0:
            c_tile = cand
            break

    # Row tile bounded by the pass-2 working set (~4 live full-width buffers).
    row_tile = tile_budget // (4 * cw * max(itemsize, 4))
    row_tile = max(8, (row_tile // 8) * 8)
    row_tile = min(row_tile, _MAX_ROW_TILE, _round_up(r, 8))

    n_r = pl.cdiv(r, row_tile)
    n_c = cw // c_tile
    needs_mask = (r % row_tile) != 0

    # ---- Pass 1: per-lane shifted sum and sum-of-squares ----
    stats_kernel = functools.partial(
        _stats_kernel, rows_valid=r, row_tile=row_tile, needs_mask=needs_mask)
    sums, sqs = pl.pallas_call(
        stats_kernel,
        out_shape=(
            jax.ShapeDtypeStruct((1, cw), jnp.float32),
            jax.ShapeDtypeStruct((1, cw), jnp.float32),
        ),
        grid_spec=pltpu.PrefetchScalarGridSpec(
            num_scalar_prefetch=0,
            grid=(n_c, n_r),
            in_specs=[
                pl.BlockSpec((row_tile, c_tile), lambda cb, i: (i, cb)),
                pl.BlockSpec((1, c_tile), lambda cb, i: (0, cb)),
            ],
            out_specs=(
                pl.BlockSpec((1, c_tile), lambda cb, i: (0, cb)),
                pl.BlockSpec((1, c_tile), lambda cb, i: (0, cb)),
            ),
            scratch_shapes=[
                pltpu.VMEM((8, c_tile), jnp.float32),
                pltpu.VMEM((8, c_tile), jnp.float32),
            ],
        ),
        compiler_params=pltpu.CompilerParams(
            dimension_semantics=("parallel", "arbitrary"),
            vmem_limit_bytes=vmem_limit,
        ),
        cost_estimate=pl.CostEstimate(
            flops=int(4 * r * cw),
            transcendentals=0,
            bytes_accessed=int(r * cw * itemsize + 3 * cw * 4),
        ),
    )(xw, shift_w)

    # ---- Pass 2: glue math folded in + single FMA ----
    apply_kernel = functools.partial(_apply_kernel, n_true=n_true, k=k, eps=eps)
    yw = pl.pallas_call(
        apply_kernel,
        out_shape=jax.ShapeDtypeStruct((r, cw), xw.dtype),
        grid_spec=pltpu.PrefetchScalarGridSpec(
            num_scalar_prefetch=0,
            grid=(n_r,),
            in_specs=[
                pl.BlockSpec((row_tile, cw), lambda i: (i, 0)),
                pl.BlockSpec((1, cw), lambda i: (0, 0)),
                pl.BlockSpec((1, cw), lambda i: (0, 0)),
                pl.BlockSpec((1, cw), lambda i: (0, 0)),
                pl.BlockSpec((1, cw), lambda i: (0, 0)),
                pl.BlockSpec((1, cw), lambda i: (0, 0)),
            ],
            out_specs=pl.BlockSpec((row_tile, cw), lambda i: (i, 0)),
        ),
        compiler_params=pltpu.CompilerParams(
            dimension_semantics=("parallel",),
            vmem_limit_bytes=vmem_limit,
        ),
        cost_estimate=pl.CostEstimate(
            flops=int(2 * r * cw),
            transcendentals=int(cw),
            bytes_accessed=int(2 * r * cw * itemsize + 5 * cw * 4),
        ),
    )(xw, sums, sqs, gamma_w, beta_w, shift_w)
    return yw


# --------------------------------------------------------------------------- #
# Public wrapper (matches the PyTorch module's forward).
# --------------------------------------------------------------------------- #
def batchnorm1d_forward(x, gamma, beta, eps=1e-5, fuse_bytes=None):
    """x: (B, L, C). gamma, beta: (C,). Training-mode BatchNorm1d over (B, L)."""
    B, L, C = x.shape
    N = B * L
    x2d = x.reshape(N, C)
    gamma2d = gamma.reshape(1, C).astype(jnp.float32)
    beta2d = beta.reshape(1, C).astype(jnp.float32)

    vmem_limit, tile_budget, fuse_default = _budgets()
    if fuse_bytes is None:
        fuse_bytes = fuse_default

    # Lane-widen when C < 128 so loads/stores/VPU ops are full-lane (128) dense.
    k = 1
    if C < 128 and 128 % C == 0 and N % (128 // C) == 0:
        k = 128 // C
    xw = x2d.reshape(N // k, k * C)              # free, contiguous reshape
    gamma_w = jnp.tile(gamma2d, (1, k)) if k > 1 else gamma2d
    beta_w = jnp.tile(beta2d, (1, k)) if k > 1 else beta2d
    # Per-channel shift (uniform across lane replicas) for numerically stable
    # shifted-moment accumulation; tiny (1, C) HBM read.
    shift = x2d[0:1, :].astype(jnp.float32)
    shift_w = jnp.tile(shift, (1, k)) if k > 1 else shift

    if N * C * 4 <= fuse_bytes:
        # Small/mid input: one fused kernel, x read from HBM exactly once.
        yw = _fused_forward(xw, gamma_w, beta_w, shift_w, eps, N, k, vmem_limit)
    else:
        yw = _two_pass_forward(xw, gamma_w, beta_w, shift_w, eps, N, k,
                               vmem_limit, tile_budget)
    return yw.reshape(B, L, C)

    # TODO(synk): running_mean/running_var buffer updates (momentum) are
    # training-state bookkeeping and do not affect the training-mode output.


if __name__ == "__main__":
    # Primary small-shape test (consistent with the module's usage): fused path
    # with lane-widening (C=32 -> cw=128) and in-kernel replica combine.
    B, L, C = 2, 8, 32  # (batch, seq, num_features)
    key = jax.random.PRNGKey(0)
    k_small, k_big = jax.random.split(key)
    x = jax.random.normal(k_small, (B, L, C), dtype=jnp.float32)
    gamma = jnp.ones((C,), dtype=jnp.float32)   # nn.BatchNorm1d default init
    beta = jnp.zeros((C,), dtype=jnp.float32)

    y = batchnorm1d_forward(x, gamma, beta)
    y = jax.block_until_ready(y)

    mean_ref = jnp.mean(x, axis=(0, 1), keepdims=True)
    var_ref = jnp.var(x, axis=(0, 1), keepdims=True)
    y_ref = (x - mean_ref) / jnp.sqrt(var_ref + 1e-5) * gamma + beta
    assert jnp.allclose(y, y_ref, atol=1e-4, rtol=1e-4), "fused path mismatch"

    # Exercise the two-pass tiled path too (forced), including edge-only
    # ragged-tail masking, lane-widening, in-kernel replica combine in pass 2,
    # and non-trivial affine params / non-zero mean data.
    B2, L2, C2 = 4, 300, 32
    x2 = 3.0 + 0.5 * jax.random.normal(k_big, (B2, L2, C2), dtype=jnp.float32)
    gamma2 = jnp.linspace(0.5, 1.5, C2).astype(jnp.float32)
    beta2 = jnp.linspace(-0.2, 0.2, C2).astype(jnp.float32)
    y2 = batchnorm1d_forward(x2, gamma2, beta2, fuse_bytes=0)
    y2 = jax.block_until_ready(y2)

    mean2 = jnp.mean(x2, axis=(0, 1), keepdims=True)
    var2 = jnp.var(x2, axis=(0, 1), keepdims=True)
    y2_ref = (x2 - mean2) / jnp.sqrt(var2 + 1e-5) * gamma2 + beta2
    assert jnp.allclose(y2, y2_ref, atol=1e-4, rtol=1e-4), "two-pass mismatch"

    print("KERNEL_OK")
</pallas_src>

<mosaic_0001>
module attributes {stable_mosaic.version = 11 : i64} {
  func.func @_fused_kernel(%arg0: i32, %arg1: memref<4x128xf32, #tpu.memory_space<vmem>>, %arg2: memref<1x128xf32, #tpu.memory_space<vmem>>, %arg3: memref<1x128xf32, #tpu.memory_space<vmem>>, %arg4: memref<1x128xf32, #tpu.memory_space<vmem>>, %arg5: memref<4x128xf32, #tpu.memory_space<vmem>>) attributes {dimension_semantics = [#tpu.dimension_semantics<parallel>], iteration_bounds = array<i64: 1>, scalar_prefetch = 0 : i64, scratch_operands = 0 : i64, tpu.core_type = #tpu.core_type<tc>, window_params = [{transform_indices = @transform_0, window_bounds = array<i64: 4, 128>}, {transform_indices = @transform_1, window_bounds = array<i64: 1, 128>}, {transform_indices = @transform_2, window_bounds = array<i64: 1, 128>}, {transform_indices = @transform_3, window_bounds = array<i64: 1, 128>}, {transform_indices = @transform_4, window_bounds = array<i64: 4, 128>}]} {
    %c0 = arith.constant 0 : index
    %c0_0 = arith.constant 0 : index
    %0 = vector.load %arg1[%c0, %c0_0] : memref<4x128xf32, #tpu.memory_space<vmem>>, vector<4x128xf32>
    %c0_1 = arith.constant 0 : index
    %c0_2 = arith.constant 0 : index
    %1 = vector.load %arg4[%c0_1, %c0_2] : memref<1x128xf32, #tpu.memory_space<vmem>>, vector<1x128xf32>
    %2 = vector.broadcast %1 : vector<1x128xf32> to vector<4x128xf32>
    %3 = arith.subf %0, %2 : vector<4x128xf32>
    %cst = arith.constant dense<0.000000e+00> : vector<128xf32>
    %4 = vector.multi_reduction <add>, %3, %cst [0] : vector<4x128xf32> to vector<128xf32>
    %5 = vector.shape_cast %4 : vector<128xf32> to vector<1x128xf32>
    %6 = arith.mulf %3, %3 : vector<4x128xf32>
    %cst_3 = arith.constant dense<0.000000e+00> : vector<128xf32>
    %7 = vector.multi_reduction <add>, %6, %cst_3 [0] : vector<4x128xf32> to vector<128xf32>
    %8 = vector.shape_cast %7 : vector<128xf32> to vector<1x128xf32>
    %c64_i32 = arith.constant 64 : i32
    %9 = tpu.dynamic_rotate %5 by %c64_i32 dim 1 : vector<1x128xf32>, i32 -> vector<1x128xf32>
    %10 = arith.addf %5, %9 : vector<1x128xf32>
    %c32_i32 = arith.constant 32 : i32
    %11 = tpu.dynamic_rotate %10 by %c32_i32 dim 1 : vector<1x128xf32>, i32 -> vector<1x128xf32>
    %12 = arith.addf %10, %11 : vector<1x128xf32>
    %c64_i32_4 = arith.constant 64 : i32
    %13 = tpu.dynamic_rotate %8 by %c64_i32_4 dim 1 : vector<1x128xf32>, i32 -> vector<1x128xf32>
    %14 = arith.addf %8, %13 : vector<1x128xf32>
    %c32_i32_5 = arith.constant 32 : i32
    %15 = tpu.dynamic_rotate %14 by %c32_i32_5 dim 1 : vector<1x128xf32>, i32 -> vector<1x128xf32>
    %16 = arith.addf %14, %15 : vector<1x128xf32>
    %cst_6 = arith.constant 6.250000e-02 : f32
    %17 = vector.broadcast %cst_6 : f32 to vector<1x128xf32>
    %18 = arith.mulf %12, %17 : vector<1x128xf32>
    %cst_7 = arith.constant 6.250000e-02 : f32
    %19 = vector.broadcast %cst_7 : f32 to vector<1x128xf32>
    %20 = arith.mulf %16, %19 : vector<1x128xf32>
    %21 = arith.mulf %18, %18 : vector<1x128xf32>
    %22 = arith.subf %20, %21 : vector<1x128xf32>
    %cst_8 = arith.constant 0.000000e+00 : f32
    %23 = vector.broadcast %cst_8 : f32 to vector<1x128xf32>
    %24 = arith.maximumf %22, %23 : vector<1x128xf32>
    %cst_9 = arith.constant 9.99999974E-6 : f32
    %25 = vector.broadcast %cst_9 : f32 to vector<1x128xf32>
    %26 = arith.addf %24, %25 : vector<1x128xf32>
    %27 = math.rsqrt %26 : vector<1x128xf32>
    %c0_10 = arith.constant 0 : index
    %c0_11 = arith.constant 0 : index
    %28 = vector.load %arg2[%c0_10, %c0_11] : memref<1x128xf32, #tpu.memory_space<vmem>>, vector<1x128xf32>
    %29 = arith.mulf %27, %28 : vector<1x128xf32>
    %c0_12 = arith.constant 0 : index
    %c0_13 = arith.constant 0 : index
    %30 = vector.load %arg3[%c0_12, %c0_13] : memref<1x128xf32, #tpu.memory_space<vmem>>, vector<1x128xf32>
    %31 = arith.mulf %18, %29 : vector<1x128xf32>
    %32 = arith.subf %30, %31 : vector<1x128xf32>
    %33 = vector.broadcast %29 : vector<1x128xf32> to vector<4x128xf32>
    %34 = arith.mulf %3, %33 : vector<4x128xf32>
    %35 = vector.broadcast %32 : vector<1x128xf32> to vector<4x128xf32>
    %36 = arith.addf %34, %35 : vector<4x128xf32>
    %c0_14 = arith.constant 0 : index
    %c0_15 = arith.constant 0 : index
    %37 = vector.load %arg5[%c0_14, %c0_15] : memref<4x128xf32, #tpu.memory_space<vmem>>, vector<4x128xf32>
    tpu.vector_store %arg5[%c0_14, %c0_15], %36 {strides = array<i32>} : memref<4x128xf32, #tpu.memory_space<vmem>>, vector<4x128xf32>,
    return
  }
  func.func @transform_0(%arg0: i32) -> (i32, i32) {
    %c0_i32 = arith.constant 0 : i32
    %c0_i32_0 = arith.constant 0 : i32
    return %c0_i32, %arg0 : i32, i32
  }
  func.func @transform_1(%arg0: i32) -> (i32, i32) {
    %c0_i32 = arith.constant 0 : i32
    %c0_i32_0 = arith.constant 0 : i32
    return %c0_i32, %arg0 : i32, i32
  }
  func.func @transform_2(%arg0: i32) -> (i32, i32) {
    %c0_i32 = arith.constant 0 : i32
    %c0_i32_0 = arith.constant 0 : i32
    return %c0_i32, %arg0 : i32, i32
  }
  func.func @transform_3(%arg0: i32) -> (i32, i32) {
    %c0_i32 = arith.constant 0 : i32
    %c0_i32_0 = arith.constant 0 : i32
    return %c0_i32, %arg0 : i32, i32
  }
  func.func @transform_4(%arg0: i32) -> (i32, i32) {
    %c0_i32 = arith.constant 0 : i32
    %c0_i32_0 = arith.constant 0 : i32
    return %c0_i32, %arg0 : i32, i32
  }
}

</mosaic_0001>

<bundles_post_ra>
// kernel: tpu_custom_call.1
= control target key start
LH: loop header
LB: loop body
LE: loop exit
PB: predicated region body
PF: predicated region fallthrough
CT: control target
= control target key end

     0   :  { %9 = vsyncpa [#allocation3], 0  ;;  %s202_s0 = inlined_call_operand.hbm [shape: f32[4,128], index: 0, kind: input, shape index: {}]   ;;  %s203_s1 = inlined_call_operand.vmem [shape: f32[1,128], index: 1, kind: input, shape index: {}]   ;;  %s204_s2 = inlined_call_operand.vmem [shape: f32[1,128], index: 2, kind: input, shape index: {}]   ;;  %s205_s3 = inlined_call_operand.vmem [shape: f32[1,128], index: 3, kind: input, shape index: {}]   ;;  %s206_s4 = inlined_call_operand.hbm [shape: f32[4,128], index: 4, kind: output, shape index: {}]  }
   0x1   :  { %10 = vsyncpa [#allocation4], 0  ;;  %s158_s15 = smov [#allocation2]  }
   0x2   :  { %s17_s16 = sshll.u32 %s158_s15, 4  ;;  %s18_s16 = int_to_ptr.vmem [resolvable:$true] %s17_s16 }
   0x3   :  { %s122_s17 = scalar_lea.vmem %s18_s16, 64  ;;  %p127_p1 = scmp.lt.s32.totalorder %s18_s16, %s18_s16 }
   0x4   :  { %p123_p0 = scmp.ne.s32.totalorder %s18_s16, %s122_s17  ;;  %p128_p2 = scmp.lt.s32.totalorder %s122_s17, %s122_s17 }
   0x6   :  { %p129_p3 = por %p128_p2, %p127_p1 }
   0x8   :  { %p130_p4 = pnand %p129_p3, %p123_p0 }
   0xa   :  { %133 = shalt.err (!%p130_p4)
}
   0xb   :  { %20 = dma.hbm_to_vmem [thread:$0]  %s202_s0, 64, %s18_s16, [#allocation3]  }
   0xc   :  { %154 = dma.done.wait [#allocation3], 64  }
   0xd   :  { %155 = vsyncadd [#allocation3], 4294967232  ;;  %v30_v0 = vld [vmem:[#allocation2] sm:$0xf]  ;;  %vm39_vm0 = vcmask 1043456   ;;  %s159_s0 = smov 64   ;;  %v79_v32 = vlaneseq }
   0xe   :  { %v107_v1 = vld [vmem:[%s205_s3] ss:$0 sm:$0xff]  ;;  %s160_s3 = smov 32   ;;  %s161_s26 = smov [#allocation5]  }
   0xf   :  { %v38_v2 = vsub.f32 %v30_v0, %v107_v1  ;;  %v80_v33 = vshrl.u32 %v79_v32, 7  ;;  %v74_v34 = vld [vmem:[%s203_s1] sm:$0x1]  ;;  %s98_s27 = sshll.u32 %s161_s26, 4  ;;  %s99_s27 = int_to_ptr.vmem [resolvable:$true] %s98_s27 }
  0x10   :  { %v76_v38 = vld [vmem:[%s204_s2] sm:$0x1]  ;;  %s134_s28 = scalar_lea.vmem %s99_s27, 64  ;;  %p139_p6 = scmp.lt.s32.totalorder %s99_s27, %s99_s27 }
  0x11   :  { %v40_v3 = vsel %vm39_vm0, %v38_v2, 0.0  ;;  %v47_v4 = vmul.f32 %v38_v2, %v38_v2  ;;  %v81_v35 = vsub.s32 0, %v80_v33  ;;  %p135_p5 = scmp.ne.s32.totalorder %s99_s27, %s134_s28  ;;  %p140_p7 = scmp.lt.s32.totalorder %s134_s28, %s134_s28 }
  0x12   :  { %v41_v5 = vrot.slane %v40_v3, 4 }
  0x13   :  { %v48_v6 = vsel %vm39_vm0, %v47_v4, 0.0  ;;  %p141_p8 = por %p140_p7, %p139_p6 }
  0x14   :  { %v42_v7 = vadd.f32 %v41_v5, %v40_v3  ;;  %v49_v8 = vrot.slane %v48_v6, 4 }
  0x15   :  { %p142_p9 = pnand %p141_p8, %p135_p5 }
  0x16   :  { %v43_v9 = vrot.slane %v42_v7, 2  ;;  %v50_v10 = vadd.f32 %v49_v8, %v48_v6 }
  0x18   :  { %v44_v11 = vadd.f32 %v43_v9, %v42_v7  ;;  %v51_v12 = vrot.slane %v50_v10, 2 }
  0x1a   :  { %v45_v13 = vrot.slane %v44_v11, 1  ;;  %v52_v14 = vadd.f32 %v51_v12, %v50_v10 }
  0x1c   :  { %v46_v15 = vadd.f32 %v45_v13, %v44_v11  ;;  %v53_v16 = vrot.slane %v52_v14, 1 }
  0x1e   :  { %55 = vrot.lane.b32.xlu0 %v46_v15, %s159_s0  ;;  %v54_v17 = vadd.f32 %v53_v16, %v52_v14 }
  0x22   :  { %61 = vrot.lane.b32.xlu0 %v54_v17, %s159_s0 }
  0x90   :  { %v56_v18 = vpop.permute.xlu0 %55 }
  0x91   :  { %v57_v19 = vadd.f32 %v56_v18, %v46_v15 }
  0x93   :  { %58 = vrot.lane.b32.xlu1 %v57_v19, %s160_s3 }
  0x94   :  { %v62_v20 = vpop.permute.xlu0 %61 }
  0x95   :  { %v63_v21 = vadd.f32 %v62_v20, %v54_v17 }
  0x97   :  { %64 = vrot.lane.b32.xlu1 %v63_v21, %s160_s3 }
 0x105   :  { %v59_v22 = vpop.permute.xlu1 %58 }
 0x106   :  { %v60_v23 = vadd.f32 %v59_v22, %v57_v19 }
 0x108   :  { %v67_v24 = vmul.f32 0.0625, %v60_v23 }
 0x109   :  { %v65_v25 = vpop.permute.xlu1 %64 }
 0x10a   :  { %v66_v26 = vadd.f32 %v65_v25, %v63_v21  ;;  %v69_v27 = vmul.f32 %v67_v24, %v67_v24 }
 0x10c   :  { %v68_v28 = vmul.f32 0.0625, %v66_v26 }
 0x10e   :  { %v70_v29 = vsub.f32 %v68_v28, %v69_v27 }
 0x110   :  { %v71_v30 = vmax.f32 %v70_v29, 0.0 }
 0x112   :  { %v72_v31 = vadd.f32 1e-05, %v71_v30 }
 0x114   :  { %112 = vrsqrt.f32 %v72_v31 }
 0x121   :  { %v113_v36 = vpop.eup %112 }
 0x122   :  { %v75_v37 = vmul.f32 %v113_v36, %v74_v34 }
 0x124   :  { %v77_v39 = vmul.f32 %v75_v37, %v67_v24  ;;  %v82_v40 = vrot.slane %v75_v37, %v81_v35 }
 0x126   :  { %v78_v41 = vsub.f32 %v76_v38, %v77_v39  ;;  %v83_v42 = vmul.f32 %v82_v40, %v38_v2 }
 0x128   :  { %v88_v43 = vrot.slane %v78_v41, %v81_v35 }
 0x12a   :  { %v90_v44 = vadd.f32 %v88_v43, %v83_v42 }
 0x12c   :  { %91 = vst [vmem:[#allocation5] sm:$0xf] %v90_v44 }
 0x12d   :  { %145 = shalt.err (!%p142_p9)
}
 0x12e   :  { %101 = dma.vmem_to_hbm [thread:$0]  %s99_s27, 64, %s206_s4, [#allocation4]  }
 0x12f   :  { %156 = dma.done.wait [#allocation4], 64  }
 0x130   :  { %157 = vsyncadd [#allocation4], 4294967232 }
 0x131   :  { %105 = vsyncpa [#allocation3], 1 }
 0x132   :  { %106 = vsyncpa [#allocation4], 1 }

</bundles_post_ra>
